<compile_context>
chip_gen: v7x
topology: tpu7x:2x2x1
jax: 0.10.0
libtpu: 0.0.40
codegen_flags: <defaults>
</compile_context>

<pallas_src>
import functools
import math

import jax
import jax.numpy as jnp
from jax.experimental import pallas as pl
from jax.experimental.pallas import tpu as pltpu


def _round_up(x, m):
    return ((x + m - 1) // m) * m


def _pe_kernel(const_ref, o_ref, *, d_model, b_chunk, block_s):
    """Writes one (block_s, b_chunk * d_model) tile of the positional encoding.

    const_ref: (2, d_model) resident constants block.
      row 0 = frequency table  exp(-(2*(k//2)) * ln(10000) / d_model)
      row 1 = parity (1.0 for odd feature index, 0.0 for even)
    """
    i = pl.program_id(0)
    S = o_ref.shape[0]  # == block_s (or seq_len when seq_len <= 8)

    # Global sequence position for this tile: (S, 1)
    pos = (jax.lax.broadcasted_iota(jnp.int32, (S, 1), 0) + i * block_s).astype(
        jnp.float32
    )

    freq = const_ref[0:1, :]           # (1, d_model)
    is_odd = const_ref[1:2, :] > 0.5   # (1, d_model) bool

    angle = pos * freq                                       # (S, d_model)
    # even feature -> sin(angle), odd feature -> cos(angle); exact parity with
    # the PyTorch buffer construction.
    row = jnp.where(is_odd, jnp.cos(angle), jnp.sin(angle))  # (S, d_model)

    if b_chunk == 1:
        o_ref[...] = row
    elif d_model % 128 == 0:
        # Lane-aligned per-batch slices: no tile-sized VMEM temporary, plain
        # unmasked vector stores.
        for b in range(b_chunk):
            o_ref[:, b * d_model:(b + 1) * d_model] = row
    else:
        # Per-batch slices would not be 128-lane aligned (masked partial
        # stores); fall back to a single full-width store.
        o_ref[...] = jnp.tile(row, (1, b_chunk))


def positional_encoding(x, max_len=5000):
    """Pallas equivalent of _PositionalEncoding.forward(x).

    x: (seq_len, batch, d_model) -- only the shape is used.
    returns float32 (seq_len, batch, d_model)
    """
    seq_len, batch, d_model = x.shape
    assert seq_len <= max_len
    assert d_model % 2 == 0, "PyTorch reference requires even d_model"

    # Per-output-buffer VMEM budget (output is double-buffered by the pipeline).
    vmem_per_buf = 4 * 1024 * 1024

    # ---- batch-chunk guard for very large batch * d_model ----------------
    # If even an 8-row, full-lane tile exceeds the budget, split the batch
    # axis into 128-lane-aligned chunks via a second grid axis.
    b_chunk = batch
    if 8 * batch * d_model * 4 > vmem_per_buf:
        for cand in range(batch - 1, 0, -1):
            if batch % cand != 0:
                continue
            if (cand * d_model) % 128 != 0:
                continue
            if 8 * cand * d_model * 4 <= vmem_per_buf:
                b_chunk = cand
                break
        # If no aligned divisor fits, keep the full lane (still correct; just
        # uses a larger tile than the nominal budget).
    chunk_lane = b_chunk * d_model
    bytes_per_row = chunk_lane * 4

    # ---- sequence tiling ---------------------------------------------------
    if seq_len <= 8:
        block_s = seq_len  # full first dim -> exempt from the (8, ...) rule
    else:
        max_rows = max(8, vmem_per_buf // bytes_per_row)
        seq_rounded = _round_up(seq_len, 8)
        # Keep >= 2 grid steps along the seq axis so "parallel" semantics can
        # shard across the two TensorCores on v7x.
        half = _round_up(pl.cdiv(seq_len, 2), 8)
        block_s = min(max_rows, 2048, seq_rounded, half)
        block_s -= block_s % 8
        block_s = max(block_s, 8)

    grid = (pl.cdiv(seq_len, block_s), batch // b_chunk)

    # ---- hoisted constants: frequency table + feature parity ---------------
    d_idx = jnp.arange(d_model, dtype=jnp.int32)
    freq = jnp.exp(
        (d_idx // 2).astype(jnp.float32)
        * jnp.float32(-2.0 * math.log(10000.0) / d_model)
    )
    parity = (d_idx % 2).astype(jnp.float32)
    consts = jnp.stack([freq, parity], axis=0)  # (2, d_model) f32

    kernel = functools.partial(
        _pe_kernel, d_model=d_model, b_chunk=b_chunk, block_s=block_s
    )

    n_steps = grid[0] * grid[1]
    cost = pl.CostEstimate(
        flops=2 * n_steps * block_s * d_model,
        transcendentals=2 * n_steps * block_s * d_model,
        bytes_accessed=seq_len * batch * d_model * 4 + 2 * d_model * 4,
    )

    out_flat = pl.pallas_call(
        kernel,
        out_shape=jax.ShapeDtypeStruct((seq_len, batch * d_model), jnp.float32),
        grid=grid,
        in_specs=[pl.BlockSpec((2, d_model), lambda i, j: (0, 0))],
        out_specs=pl.BlockSpec((block_s, chunk_lane), lambda i, j: (i, j)),
        compiler_params=pltpu.CompilerParams(
            dimension_semantics=("parallel", "parallel"),
            vmem_limit_bytes=32 * 1024 * 1024,
        ),
        cost_estimate=cost,
    )(consts)

    # Pure metadata reshape back to the module's (seq_len, batch, d_model).
    return out_flat.reshape(seq_len, batch, d_model)


def _reference_pe(seq_len, batch, d_model):
    """Pure-JAX replica of the PyTorch buffer construction + forward."""
    position = jnp.arange(seq_len, dtype=jnp.float32)[:, None]            # (S, 1)
    div_term = jnp.exp(
        jnp.arange(0, d_model, 2, dtype=jnp.float32)
        * (-(math.log(10000.0) / d_model))
    )                                                                     # (D/2,)
    pe = jnp.zeros((seq_len, d_model), jnp.float32)
    pe = pe.at[:, 0::2].set(jnp.sin(position * div_term))
    pe = pe.at[:, 1::2].set(jnp.cos(position * div_term))
    pe = pe[:, None, :]                                                   # (S, 1, D)
    return jnp.tile(pe, (1, batch, 1))                                    # (S, B, D)


if __name__ == "__main__":
    key = jax.random.PRNGKey(0)
    seq_len, batch, d_model = 8, 2, 64
    x = jax.random.normal(key, (seq_len, batch, d_model), dtype=jnp.float32)

    out = positional_encoding(x)
    out = jax.block_until_ready(out)

    ref = _reference_pe(seq_len, batch, d_model)
    assert out.shape == (seq_len, batch, d_model)
    assert out.dtype == jnp.float32
    assert jnp.allclose(out, ref, atol=1e-5, rtol=1e-5), "mismatch vs reference"

    print("KERNEL_OK")
</pallas_src>

<mosaic_0001>
module attributes {stable_mosaic.version = 11 : i64} {
  func.func @_pe_kernel(%arg0: i32, %arg1: i32, %arg2: memref<2x64xf32, #tpu.memory_space<vmem>>, %arg3: memref<8x128xf32, #tpu.memory_space<vmem>>) attributes {dimension_semantics = [#tpu.dimension_semantics<parallel>, #tpu.dimension_semantics<parallel>], iteration_bounds = array<i64: 1, 1>, scalar_prefetch = 0 : i64, scratch_operands = 0 : i64, tpu.core_type = #tpu.core_type<tc>, window_params = [{pipeline_mode = #tpu.pipeline_mode<synchronous>, transform_indices = @transform_0, window_bounds = array<i64: 2, 64>}, {transform_indices = @transform_1, window_bounds = array<i64: 8, 128>}]} {
    %0 = tpu.iota {dimensions = array<i32: 0>} : vector<8x1xi32>
    %c8_i32 = arith.constant 8 : i32
    %1 = arith.muli %arg0, %c8_i32 : i32
    %2 = vector.broadcast %1 : i32 to vector<8x1xi32>
    %3 = arith.addi %0, %2 : vector<8x1xi32>
    %4 = arith.sitofp %3 : vector<8x1xi32> to vector<8x1xf32>
    %c0 = arith.constant 0 : index
    %c0_0 = arith.constant 0 : index
    %5 = vector.load %arg2[%c0, %c0_0] : memref<2x64xf32, #tpu.memory_space<vmem>>, vector<1x64xf32>
    %c1 = arith.constant 1 : index
    %c0_1 = arith.constant 0 : index
    %6 = vector.load %arg2[%c1, %c0_1] : memref<2x64xf32, #tpu.memory_space<vmem>>, vector<1x64xf32>
    %cst = arith.constant 5.000000e-01 : f32
    %7 = vector.broadcast %cst : f32 to vector<1x64xf32>
    %8 = arith.cmpf ogt, %6, %7 : vector<1x64xf32>
    %9 = vector.broadcast %4 : vector<8x1xf32> to vector<8x64xf32>
    %10 = vector.broadcast %5 : vector<1x64xf32> to vector<8x64xf32>
    %11 = arith.mulf %9, %10 : vector<8x64xf32>
    %12 = math.cos %11 : vector<8x64xf32>
    %13 = math.sin %11 : vector<8x64xf32>
    %14 = vector.shape_cast %8 : vector<1x64xi1> to vector<1x64xi1>
    %15 = vector.broadcast %14 : vector<1x64xi1> to vector<8x64xi1>
    %16 = arith.select %15, %12, %13 : vector<8x64xi1>, vector<8x64xf32>
    %17 = tpu.concatenate %16, %16 in 1 : vector<8x64xf32>, vector<8x64xf32> -> vector<8x128xf32>
    %c0_2 = arith.constant 0 : index
    %c0_3 = arith.constant 0 : index
    %18 = vector.load %arg3[%c0_2, %c0_3] : memref<8x128xf32, #tpu.memory_space<vmem>>, vector<8x128xf32>
    tpu.vector_store %arg3[%c0_2, %c0_3], %17 {strides = array<i32>} : memref<8x128xf32, #tpu.memory_space<vmem>>, vector<8x128xf32>,
    return
  }
  func.func @transform_0(%arg0: i32, %arg1: i32) -> (i32, i32) {
    %c0_i32 = arith.constant 0 : i32
    %c0_i32_0 = arith.constant 0 : i32
    %c0_i32_1 = arith.constant 0 : i32
    return %c0_i32, %c0_i32_0 : i32, i32
  }
  func.func @transform_1(%arg0: i32, %arg1: i32) -> (i32, i32) {
    %c0_i32 = arith.constant 0 : i32
    return %arg0, %arg1 : i32, i32
  }
}

</mosaic_0001>

<bundles_post_ra>
// kernel: tpu_custom_call.1
= control target key start
LH: loop header
LB: loop body
LE: loop exit
PB: predicated region body
PF: predicated region fallthrough
CT: control target
= control target key end

     0   :  { %6 = vsyncpa [#allocation3], 0  ;;  %s415_s0 = inlined_call_operand.hbm [shape: f32[2,64], index: 0, kind: input, shape index: {}]   ;;  %s416_s1 = inlined_call_operand.hbm [shape: f32[8,128], index: 1, kind: output, shape index: {}]  }
   0x1   :  { %7 = vsyncpa [#allocation4], 0  ;;  %s346_s6 = smov [#allocation2]   ;;  %s298_s10 = scalar_lea.hbm %s415_s0, 32 }
   0x2   :  { %s14_s7 = sshll.u32 %s346_s6, 4  ;;  %p299_p0 = scmp.ne.s32.totalorder %s415_s0, %s298_s10  ;;  %s15_s7 = int_to_ptr.vmem [resolvable:$true] %s14_s7 }
   0x3   :  { %p302_p1 = scmp.lt.u32.totalorder %s298_s10, %s415_s0 }
   0x5   :  { %p304_p2 = pnand %p302_p1, %p299_p0 }
   0x7   :  { %307 = shalt.err (!%p304_p2)
}
   0x8   :  { %s308_s15 = scalar_lea.vmem %s15_s7, 32  ;;  %p313_p4 = scmp.lt.s32.totalorder %s15_s7, %s15_s7 }
   0x9   :  { %p309_p3 = scmp.ne.s32.totalorder %s15_s7, %s308_s15  ;;  %p314_p5 = scmp.lt.s32.totalorder %s308_s15, %s308_s15 }
   0xb   :  { %p315_p6 = por %p314_p5, %p313_p4 }
   0xd   :  { %p316_p7 = pnand %p315_p6, %p309_p3 }
   0xf   :  { %319 = shalt.err (!%p316_p7)
}
  0x10   :  { %17 = dma.hbm_to_vmem [thread:$0]  %s415_s0, 32, %s15_s7, [#allocation3]  }
  0x11   :  { %342 = dma.done.wait [#allocation3], 32  }
  0x12   :  { %343 = vsyncadd [#allocation3], 4294967264  ;;  %v21_v0 = vlaneseq  ;;  %v271_v3 = vld [vmem:[#allocation2] ss:$0 sm:$0xff]  ;;  %v347_v16 = vmov 683565275  }
  0x13   :  { %v348_v18 = vmov 2475754826   ;;  %v349_v20 = vmov 2131351028   ;;  %v350_v22 = vmov 2102212464  }
  0x14   :  { %v378_v1 = vshrl.u32 %v21_v0, 7  ;;  %v351_v24 = vmov 920167782   ;;  %v352_v31 = vmov 1326507024   ;;  %s354_s0 = smov 64  }
  0x15   :  { %s355_s18 = smov [#allocation5]  }
  0x16   :  { %v26_v2 = vcvt.s32.f32 %v378_v1  ;;  %s262_s19 = sshll.u32 %s355_s18, 4  ;;  %s263_s19 = int_to_ptr.vmem [resolvable:$true] %s262_s19 }
  0x17   :  { %s320_s20 = scalar_lea.vmem %s263_s19, 128  ;;  %p325_p9 = scmp.lt.s32.totalorder %s263_s19, %s263_s19 }
  0x18   :  { %v381_v4 = vmul.f32 %v271_v3, %v26_v2  ;;  %p321_p8 = scmp.ne.s32.totalorder %s263_s19, %s320_s20  ;;  %p326_p10 = scmp.lt.s32.totalorder %s320_s20, %s320_s20 }
  0x1a   :  { %v38_v5 = vand.u32 2139095040, %v381_v4  ;;  %v35_v7 = vand.u32 2147483647, %v381_v4  ;;  %vm37_vm7 = vcmp.lt.s32.totalorder %v381_v4, 0  ;;  %p327_p11 = por %p326_p10, %p325_p9 }
  0x1c   :  { %v39_v6 = vshrl.u32 %v38_v5, 23  ;;  %v42_v10 = vand.u32 8388607, %v35_v7  ;;  %vm36_vm8 = vcmp.le.f32.partialorder %v35_v7, 0.7853982  ;;  %p328_p12 = pnand %p327_p11, %p321_p8 }
  0x1e   :  { %v272_v8 = vadd.s32 4294967169, %v39_v6  ;;  %v43_v13 = vor.u32 8388608, %v42_v10 }
  0x20   :  { %v45_v9 = vadd.s32 1, %v272_v8  ;;  %v83_v33 = vshll.u32 %v43_v13, 8 }
  0x22   :  { %vm46_vm0 = vcmp.gt.s32.totalorder %v45_v9, 0 }
  0x23   :  { %v47_v11 = vsel %vm46_vm0, %v45_v9, 0  ;;  %vm127_vm0 = vweird.f32 %v381_v4 }
  0x24   :  { %v49_v12 = vand.u32 31, %v47_v11  ;;  %v48_v14 = vshrl.u32 %v47_v11, 5 }
  0x26   :  { %v50_v15 = vsub.s32 32, %v49_v12  ;;  %v52_v17 = vshll.u32 %v347_v16, %v49_v12  ;;  %v55_v19 = vshll.u32 %v348_v18, %v49_v12  ;;  %v58_v21 = vshll.u32 %v349_v20, %v49_v12 }
  0x27   :  { %v61_v23 = vshll.u32 %v350_v22, %v49_v12  ;;  %v64_v25 = vshll.u32 %v351_v24, %v49_v12  ;;  %vm67_vm1 = vcmp.lt.s32.totalorder %v48_v14, 1  ;;  %vm70_vm2 = vcmp.lt.s32.totalorder %v48_v14, 4 }
  0x28   :  { %v51_v26 = vshrl.u32 %v347_v16, %v50_v15  ;;  %v53_v27 = vshrl.u32 %v348_v18, %v50_v15  ;;  %v56_v28 = vshrl.u32 %v349_v20, %v50_v15  ;;  %v59_v29 = vshrl.u32 %v350_v22, %v50_v15 }
  0x29   :  { %v62_v30 = vshrl.u32 %v351_v24, %v50_v15  ;;  %v65_v32 = vshrl.u32 %v352_v31, %v50_v15  ;;  %vm68_vm3 = vcmp.lt.s32.totalorder %v48_v14, 2  ;;  %vm69_vm4 = vcmp.lt.s32.totalorder %v48_v14, 3 }
  0x2a   :  { %v54_v34 = vor.u32 %v53_v27, %v52_v17  ;;  %v57_v35 = vor.u32 %v56_v28, %v55_v19  ;;  %v60_v36 = vor.u32 %v59_v29, %v58_v21  ;;  %v245_v29 = vsub.s32 0, %v378_v1 }
  0x2b   :  { %v63_v37 = vor.u32 %v62_v30, %v61_v23  ;;  %v66_v38 = vor.u32 %v65_v32, %v64_v25  ;;  %v28_v25 = vld [vmem:[#allocation2 + $0x1] sm:$0x1]  ;;  %v353_v30 = vmov 0  }
  0x2c   :  { %v71_v39 = vsel %vm67_vm1, %v51_v26, %v54_v34  ;;  %v72_v40 = vsel %vm70_vm2, %v60_v36, 2102212464  ;;  %v75_v41 = vsel %vm67_vm1, %v54_v34, %v57_v35  ;;  %v79_v42 = vsel %vm67_vm1, %v57_v35, %v60_v36 }
  0x2d   :  { %v73_v43 = vsel %vm69_vm4, %v57_v35, %v72_v40  ;;  %v76_v44 = vsel %vm70_vm2, %v63_v37, 920167782  ;;  %v80_v45 = vsel %vm70_vm2, %v66_v38, 1326507024  ;;  %vm29_vm9 = vcmp.gt.f32.partialorder %v28_v25, 0.5 }
  0x2e   :  { %v77_v46 = vsel %vm69_vm4, %v60_v36, %v76_v44  ;;  %v81_v47 = vsel %vm69_vm4, %v63_v37, %v80_v45  ;;  %v74_v48 = vsel %vm68_vm3, %v71_v39, %v73_v43  ;;  %v242_v31 = vsel %vm29_vm9, 1, %v353_v30 }
  0x2f   :  { %v78_v49 = vsel %vm68_vm3, %v75_v41, %v77_v46  ;;  %v82_v50 = vsel %vm68_vm3, %v79_v42, %v81_v47  ;;  %v90_v55 = vmul.u32 %v83_v33, %v74_v48  ;;  %v246_v7 = vrot.slane %v242_v31, %v245_v29 }
  0x30   :  { %v387_v51 = vmul.u32.u64.low %v83_v33, %v82_v50  ;;  %v388_v52 = vmul.u32.u64.high %v83_v33, %v82_v50, %v387_v51  ;;  %v390_v53 = vmul.u32.u64.low %v83_v33, %v78_v49  ;;  %v391_v54 = vmul.u32.u64.high %v83_v33, %v78_v49, %v390_v53 }
  0x31   :  { %vm247_vm1 = vcmp.eq.s32.totalorder %v246_v7, 1  ;;  %vm253_vm2 = vcmask 523264  }
  0x32   :  { %vm92_vm5 = vc.u32 %v388_v52, %v390_v53  ;;  %v93_v56 = vadd.s32 1, %v391_v54  ;;  %v91_v5 = vadd.s32 %v390_v53, %v388_v52 }
  0x34   :  { %v94_v57 = vsel %vm92_vm5, %v93_v56, %v391_v54 }
  0x35   :  { %v95_v58 = vadd.s32 %v94_v57, %v90_v55 }
  0x37   :  { %v96_v59 = vadd.s32 536870912, %v95_v58 }
  0x39   :  { %v97_v60 = vshrl.u32 %v96_v59, 30 }
  0x3b   :  { %v98_v61 = vshll.u32 %v97_v60, 30  ;;  %v121_v18 = vsub.s32 4, %v97_v60 }
  0x3d   :  { %v99_v62 = vsub.s32 %v95_v58, %v98_v61  ;;  %v122_v21 = vsel %vm37_vm7, %v121_v18, %v97_v60 }
  0x3e   :  { %v124_v24 = vsel %vm36_vm8, 0, %v122_v21 }
  0x3f   :  { %v101_v63 = vsub.s32 0, %v99_v62  ;;  %v231_v26 = vadd.s32 3, %v124_v24  ;;  %v128_v27 = vand.u32 3, %v124_v24 }
  0x41   :  { %v273_v0 = vmin.u32 %v101_v63, %v99_v62  ;;  %v232_v28 = vand.u32 3, %v231_v26  ;;  %vm133_vm10 = vcmp.eq.s32.totalorder %v128_v27, 2  ;;  %vm130_vm12 = vcmp.eq.s32.totalorder %v128_v27, 0 }
  0x42   :  { %vm129_vm14 = vcmp.lt.s32.totalorder %v128_v27, 2 }
  0x43   :  { %v103_v2 = vclz %v273_v0  ;;  %vm237_vm11 = vcmp.eq.s32.totalorder %v232_v28, 2  ;;  %vm234_vm13 = vcmp.eq.s32.totalorder %v232_v28, 0  ;;  %vm233_vm15 = vcmp.lt.s32.totalorder %v232_v28, 2 }
  0x45   :  { %v274_v3 = vadd.s32 4294967294, %v103_v2 }
  0x47   :  { %vm275_vm6 = vcmp.lt.s32.totalorder %v274_v3, 0 }
  0x48   :  { %v106_v6 = vsel %vm275_vm6, 0, %v274_v3 }
  0x49   :  { %v107_v8 = vsub.s32 32, %v106_v6  ;;  %v108_v9 = vshll.u32 %v99_v62, %v106_v6  ;;  %v111_v10 = vsub.s32 4294967266, %v106_v6 }
  0x4b   :  { %v109_v11 = vshrl.u32 %v91_v5, %v107_v8  ;;  %v112_v12 = vadd.s32 127, %v111_v10 }
  0x4d   :  { %v110_v13 = vor.u32 %v109_v11, %v108_v9  ;;  %v113_v14 = vshll.u32 %v112_v12, 23 }
  0x4f   :  { %v114_v15 = vor.u32 4788187, %v113_v14  ;;  %v117_v16 = vcvt.s32.f32 %v110_v13 }
  0x51   :  { %v115_v17 = vand.u32 2147483647, %v114_v15 }
  0x53   :  { %v118_v19 = vmul.f32 %v117_v16, %v115_v17 }
  0x55   :  { %v119_v20 = vxor.u32 2147483648, %v118_v19 }
  0x57   :  { %v120_v22 = vsel %vm37_vm7, %v119_v20, %v118_v19 }
  0x58   :  { %v123_v23 = vsel %vm36_vm8, %v381_v4, %v120_v22 }
  0x59   :  { %294 = vcosq.f32 %v123_v23 }
  0x5a   :  { %296 = vsinq.f32 %v123_v23 }
  0x63   :  { %v295_v32 = vpop.eup %294 }
  0x64   :  { %v297_v33 = vpop.eup %296  ;;  %v134_v34 = vxor.u32 2147483648, %v295_v32 }
  0x65   :  { %v131_v35 = vxor.u32 2147483648, %v297_v33 }
  0x66   :  { %v135_v36 = vsel %vm133_vm10, %v134_v34, %v297_v33  ;;  %v239_v37 = vsel %vm237_vm11, %v134_v34, %v297_v33 }
  0x67   :  { %v132_v38 = vsel %vm130_vm12, %v295_v32, %v131_v35  ;;  %v236_v39 = vsel %vm234_vm13, %v295_v32, %v131_v35 }
  0x68   :  { %v136_v1 = vsel %vm129_vm14, %v132_v38, %v135_v36  ;;  %v240_v40 = vsel %vm233_vm15, %v236_v39, %v239_v37 }
  0x69   :  { %v137_v41 = vsel %vm127_vm0, nan, %v136_v1  ;;  %v241_v42 = vsel %vm127_vm0, nan, %v240_v40 }
  0x6a   :  { %v248_v43 = vsel %vm247_vm1, %v137_v41, %v241_v42 }
  0x6b   :  { %250 = vrot.lane.b32.xlu0 %v248_v43, %s354_s0 }
  0xdd   :  { %v251_v44 = vpop.permute.xlu0 %250 }
  0xde   :  { %v254_v45 = vsel %vm253_vm2, %v248_v43, %v251_v44 }
  0xdf   :  { %255 = vst [vmem:[#allocation5] sm:$0xff] %v254_v45 }
  0xe0   :  { %331 = shalt.err (!%p328_p12)
}
  0xe1   :  { %s332_s23 = scalar_lea.hbm %s416_s1, 128 }
  0xe2   :  { %p333_p13 = scmp.ne.s32.totalorder %s416_s1, %s332_s23  ;;  %p336_p0 = scmp.lt.u32.totalorder %s332_s23, %s416_s1 }
  0xe4   :  { %p338_p1 = pnand %p336_p0, %p333_p13 }
  0xe6   :  { %341 = shalt.err (!%p338_p1)
}
  0xe7   :  { %265 = dma.vmem_to_hbm [thread:$0]  %s263_s19, 128, %s416_s1, [#allocation4]  }
  0xe8   :  { %344 = dma.done.wait [#allocation4], 128  }
  0xe9   :  { %345 = vsyncadd [#allocation4], 4294967168 }
  0xea   :  { %269 = vsyncpa [#allocation3], 1 }
  0xeb   :  { %270 = vsyncpa [#allocation4], 1 }

</bundles_post_ra>
